<compile_context>
chip_gen: v5e
topology: v5e:2x2
jax: 0.10.0
libtpu: 0.0.40
codegen_flags: <defaults>
</compile_context>

<pallas_src>
import functools

import jax
import jax.numpy as jnp
import numpy as np
from jax.experimental import pallas as pl
from jax.experimental.pallas import tpu as pltpu

LANE = 128
SUBLANE = 8


def _round_up(n, m):
    return ((n + m - 1) // m) * m


def mlp_kernel(x_ref, w1_ref, w2_ref, w3_ref, b_ref, o_ref):
    """Whole 3-layer MLP for one batch tile, entirely in VMEM / on the MXU."""
    h1p = w1_ref.shape[1]
    h2p = w2_ref.shape[1]
    outp = w3_ref.shape[1]

    x = x_ref[...]                      # (TB, num_inputs), bf16
    b = b_ref[...]                      # (8, BW) f32: rows 0/1/2 = b1/b2/b3

    # Layer 1: bf16 matmul, f32 accumulate, f32 bias + ReLU.
    h1 = jnp.dot(x, w1_ref[...], preferred_element_type=jnp.float32)
    h1 = jnp.maximum(h1 + b[0:1, :h1p], 0.0)

    # Layer 2.
    h2 = jnp.dot(h1.astype(w2_ref.dtype), w2_ref[...],
                 preferred_element_type=jnp.float32)
    h2 = jnp.maximum(h2 + b[1:2, :h2p], 0.0)

    # Layer 3 (logits) -> lane-dense (TB, 128) store.
    out = jnp.dot(h2.astype(w3_ref.dtype), w3_ref[...],
                  preferred_element_type=jnp.float32)
    o_ref[...] = (out + b[2:3, :outp]).astype(o_ref.dtype)


def neural_network_forward(x, params, *, compute_dtype=jnp.bfloat16,
                           tile_batch=512):
    """Pallas forward for NeuralNetwork: Linear(30)->ReLU->Linear(20)->ReLU->Linear(out)."""
    w1, b1, w2, b2, w3, b3 = params
    batch, num_inputs = x.shape
    h1 = w1.shape[1]
    h2 = w2.shape[1]
    num_outputs = w3.shape[1]

    # Pad every layer width up to a full 128-lane multiple.
    h1p = _round_up(h1, LANE)
    h2p = _round_up(h2, LANE)
    outp = _round_up(num_outputs, LANE)
    bwidth = max(h1p, h2p, outp)

    cd = compute_dtype
    w1p = jnp.zeros((num_inputs, h1p), cd).at[:, :h1].set(w1.astype(cd))
    w2p = jnp.zeros((h1p, h2p), cd).at[:h1, :h2].set(w2.astype(cd))
    w3p = jnp.zeros((h2p, outp), cd).at[:h2, :num_outputs].set(w3.astype(cd))

    # Pack the three biases into one (8, 128) f32 slab -> one DMA instead of three.
    bpack = jnp.zeros((SUBLANE, bwidth), jnp.float32)
    bpack = bpack.at[0, :h1].set(b1.reshape(-1).astype(jnp.float32))
    bpack = bpack.at[1, :h2].set(b2.reshape(-1).astype(jnp.float32))
    bpack = bpack.at[2, :num_outputs].set(b3.reshape(-1).astype(jnp.float32))

    # Batch tiling: large tiles for throughput, padded so the grid divides evenly.
    tb = min(tile_batch, _round_up(batch, 16))
    batch_p = _round_up(batch, tb)
    x_c = x.astype(cd)
    if batch_p != batch:
        x_c = jnp.zeros((batch_p, num_inputs), cd).at[:batch].set(x_c)

    grid = (batch_p // tb,)

    cd_bytes = jnp.dtype(cd).itemsize
    flops = 2 * batch_p * (num_inputs * h1p + h1p * h2p + h2p * outp)
    bytes_accessed = (batch_p * num_inputs * cd_bytes
                      + (num_inputs * h1p + h1p * h2p + h2p * outp) * cd_bytes
                      + SUBLANE * bwidth * 4
                      + batch_p * outp * 4)

    out_padded = pl.pallas_call(
        mlp_kernel,
        out_shape=jax.ShapeDtypeStruct((batch_p, outp), jnp.float32),
        grid=grid,
        in_specs=[
            # x: tiled along batch, software-pipelined.
            pl.BlockSpec((tb, num_inputs), lambda i: (i, 0)),
            # Weights / packed biases: constant index_map -> VMEM-resident.
            pl.BlockSpec((num_inputs, h1p), lambda i: (0, 0)),
            pl.BlockSpec((h1p, h2p), lambda i: (0, 0)),
            pl.BlockSpec((h2p, outp), lambda i: (0, 0)),
            pl.BlockSpec((SUBLANE, bwidth), lambda i: (0, 0)),
        ],
        out_specs=pl.BlockSpec((tb, outp), lambda i: (i, 0)),
        compiler_params=pltpu.CompilerParams(
            dimension_semantics=("parallel",)),
        cost_estimate=pl.CostEstimate(flops=flops,
                                      transcendentals=0,
                                      bytes_accessed=bytes_accessed),
    )(x_c, w1p, w2p, w3p, bpack)

    return out_padded[:batch, :num_outputs]


def init_params(key, num_inputs, num_outputs):
    """Deterministic init mimicking PyTorch's default Linear init (uniform +/- 1/sqrt(fan_in))."""
    dims = [(num_inputs, 30), (30, 20), (20, num_outputs)]
    params = []
    for (fan_in, fan_out) in dims:
        key, kw, kb = jax.random.split(key, 3)
        bound = 1.0 / np.sqrt(fan_in)
        w = jax.random.uniform(kw, (fan_in, fan_out), jnp.float32, -bound, bound)
        b = jax.random.uniform(kb, (fan_out,), jnp.float32, -bound, bound)
        params.extend([w, b])
    return tuple(params)


def reference_forward(x, params, compute_dtype=jnp.bfloat16):
    """Pure-JAX reference with the same bf16-weight / f32-accumulate math as the kernel."""
    w1, b1, w2, b2, w3, b3 = params
    cd = compute_dtype
    h1 = jnp.dot(x.astype(cd), w1.astype(cd),
                 preferred_element_type=jnp.float32) + b1.reshape(1, -1)
    h1 = jnp.maximum(h1, 0.0)
    h2 = jnp.dot(h1.astype(cd), w2.astype(cd),
                 preferred_element_type=jnp.float32) + b2.reshape(1, -1)
    h2 = jnp.maximum(h2, 0.0)
    return jnp.dot(h2.astype(cd), w3.astype(cd),
                   preferred_element_type=jnp.float32) + b3.reshape(1, -1)


if __name__ == "__main__":
    key = jax.random.PRNGKey(0)
    num_inputs, num_outputs = 32, 3
    batch = 8

    kx, kp = jax.random.split(key)
    x = jax.random.normal(kx, (batch, num_inputs), jnp.float32)
    params = init_params(kp, num_inputs, num_outputs)

    fwd = jax.jit(functools.partial(neural_network_forward))
    out = fwd(x, params)
    out = jax.block_until_ready(out)

    ref = reference_forward(x, params)
    np.testing.assert_allclose(np.asarray(out), np.asarray(ref),
                               rtol=1e-3, atol=1e-3)

    print("KERNEL_OK")
</pallas_src>

<mosaic_0001>
module attributes {stable_mosaic.version = 11 : i64} {
  func.func @mlp_kernel(%arg0: i32, %arg1: memref<16x32xbf16, #tpu.memory_space<vmem>>, %arg2: memref<32x128xbf16, #tpu.memory_space<vmem>>, %arg3: memref<128x128xbf16, #tpu.memory_space<vmem>>, %arg4: memref<128x128xbf16, #tpu.memory_space<vmem>>, %arg5: memref<8x128xf32, #tpu.memory_space<vmem>>, %arg6: memref<16x128xf32, #tpu.memory_space<vmem>>) attributes {dimension_semantics = [#tpu.dimension_semantics<parallel>], iteration_bounds = array<i64: 1>, scalar_prefetch = 0 : i64, scratch_operands = 0 : i64, tpu.core_type = #tpu.core_type<tc>, window_params = [{transform_indices = @transform_0, window_bounds = array<i64: 16, 32>}, {pipeline_mode = #tpu.pipeline_mode<synchronous>, transform_indices = @transform_1, window_bounds = array<i64: 32, 128>}, {pipeline_mode = #tpu.pipeline_mode<synchronous>, transform_indices = @transform_2, window_bounds = array<i64: 128, 128>}, {pipeline_mode = #tpu.pipeline_mode<synchronous>, transform_indices = @transform_3, window_bounds = array<i64: 128, 128>}, {pipeline_mode = #tpu.pipeline_mode<synchronous>, transform_indices = @transform_4, window_bounds = array<i64: 8, 128>}, {transform_indices = @transform_5, window_bounds = array<i64: 16, 128>}]} {
    %c0 = arith.constant 0 : index
    %c0_0 = arith.constant 0 : index
    %0 = vector.load %arg1[%c0, %c0_0] : memref<16x32xbf16, #tpu.memory_space<vmem>>, vector<16x32xbf16>
    %c0_1 = arith.constant 0 : index
    %c0_2 = arith.constant 0 : index
    %1 = vector.load %arg5[%c0_1, %c0_2] : memref<8x128xf32, #tpu.memory_space<vmem>>, vector<8x128xf32>
    %c0_3 = arith.constant 0 : index
    %c0_4 = arith.constant 0 : index
    %2 = vector.load %arg2[%c0_3, %c0_4] : memref<32x128xbf16, #tpu.memory_space<vmem>>, vector<32x128xbf16>
    %cst = arith.constant dense<0.000000e+00> : vector<16x128xf32>
    %3 = tpu.matmul %0, %2, %cst {dimension_numbers = #tpu.dot_dimension_numbers<[1], [0], [0], [1], [0, 0, 1, 1], [], []>} : vector<16x32xbf16>, vector<32x128xbf16>, vector<16x128xf32> -> vector<16x128xf32>
    %4 = vector.extract_strided_slice %1 {offsets = [0, 0], sizes = [1, 128], strides = [1, 1]} : vector<8x128xf32> to vector<1x128xf32>
    %5 = vector.broadcast %4 : vector<1x128xf32> to vector<16x128xf32>
    %6 = arith.addf %3, %5 : vector<16x128xf32>
    %cst_5 = arith.constant 0.000000e+00 : f32
    %7 = vector.broadcast %cst_5 : f32 to vector<16x128xf32>
    %8 = arith.maximumf %6, %7 : vector<16x128xf32>
    %9 = arith.truncf %8 : vector<16x128xf32> to vector<16x128xbf16>
    %c0_6 = arith.constant 0 : index
    %c0_7 = arith.constant 0 : index
    %10 = vector.load %arg3[%c0_6, %c0_7] : memref<128x128xbf16, #tpu.memory_space<vmem>>, vector<128x128xbf16>
    %cst_8 = arith.constant dense<0.000000e+00> : vector<16x128xf32>
    %11 = tpu.matmul %9, %10, %cst_8 {dimension_numbers = #tpu.dot_dimension_numbers<[1], [0], [0], [1], [0, 0, 1, 1], [], []>} : vector<16x128xbf16>, vector<128x128xbf16>, vector<16x128xf32> -> vector<16x128xf32>
    %12 = vector.extract_strided_slice %1 {offsets = [1, 0], sizes = [1, 128], strides = [1, 1]} : vector<8x128xf32> to vector<1x128xf32>
    %13 = vector.broadcast %12 : vector<1x128xf32> to vector<16x128xf32>
    %14 = arith.addf %11, %13 : vector<16x128xf32>
    %cst_9 = arith.constant 0.000000e+00 : f32
    %15 = vector.broadcast %cst_9 : f32 to vector<16x128xf32>
    %16 = arith.maximumf %14, %15 : vector<16x128xf32>
    %17 = arith.truncf %16 : vector<16x128xf32> to vector<16x128xbf16>
    %c0_10 = arith.constant 0 : index
    %c0_11 = arith.constant 0 : index
    %18 = vector.load %arg4[%c0_10, %c0_11] : memref<128x128xbf16, #tpu.memory_space<vmem>>, vector<128x128xbf16>
    %cst_12 = arith.constant dense<0.000000e+00> : vector<16x128xf32>
    %19 = tpu.matmul %17, %18, %cst_12 {dimension_numbers = #tpu.dot_dimension_numbers<[1], [0], [0], [1], [0, 0, 1, 1], [], []>} : vector<16x128xbf16>, vector<128x128xbf16>, vector<16x128xf32> -> vector<16x128xf32>
    %20 = vector.extract_strided_slice %1 {offsets = [2, 0], sizes = [1, 128], strides = [1, 1]} : vector<8x128xf32> to vector<1x128xf32>
    %21 = vector.broadcast %20 : vector<1x128xf32> to vector<16x128xf32>
    %22 = arith.addf %19, %21 : vector<16x128xf32>
    %c0_13 = arith.constant 0 : index
    %c0_14 = arith.constant 0 : index
    %23 = vector.load %arg6[%c0_13, %c0_14] : memref<16x128xf32, #tpu.memory_space<vmem>>, vector<16x128xf32>
    tpu.vector_store %arg6[%c0_13, %c0_14], %22 {strides = array<i32>} : memref<16x128xf32, #tpu.memory_space<vmem>>, vector<16x128xf32>,
    return
  }
  func.func @transform_0(%arg0: i32) -> (i32, i32) {
    %c0_i32 = arith.constant 0 : i32
    %c0_i32_0 = arith.constant 0 : i32
    return %arg0, %c0_i32 : i32, i32
  }
  func.func @transform_1(%arg0: i32) -> (i32, i32) {
    %c0_i32 = arith.constant 0 : i32
    %c0_i32_0 = arith.constant 0 : i32
    %c0_i32_1 = arith.constant 0 : i32
    return %c0_i32, %c0_i32_0 : i32, i32
  }
  func.func @transform_2(%arg0: i32) -> (i32, i32) {
    %c0_i32 = arith.constant 0 : i32
    %c0_i32_0 = arith.constant 0 : i32
    %c0_i32_1 = arith.constant 0 : i32
    return %c0_i32, %c0_i32_0 : i32, i32
  }
  func.func @transform_3(%arg0: i32) -> (i32, i32) {
    %c0_i32 = arith.constant 0 : i32
    %c0_i32_0 = arith.constant 0 : i32
    %c0_i32_1 = arith.constant 0 : i32
    return %c0_i32, %c0_i32_0 : i32, i32
  }
  func.func @transform_4(%arg0: i32) -> (i32, i32) {
    %c0_i32 = arith.constant 0 : i32
    %c0_i32_0 = arith.constant 0 : i32
    %c0_i32_1 = arith.constant 0 : i32
    return %c0_i32, %c0_i32_0 : i32, i32
  }
  func.func @transform_5(%arg0: i32) -> (i32, i32) {
    %c0_i32 = arith.constant 0 : i32
    %c0_i32_0 = arith.constant 0 : i32
    return %arg0, %c0_i32 : i32, i32
  }
}

</mosaic_0001>

<bundles_post_ra>
// kernel: neural_network_forward.1
= control target key start
LH: loop header
LB: loop body
LE: loop exit
PB: predicated region body
PF: predicated region fallthrough
CT: control target
= control target key end

     0   :  { %vm46_vm0 = vcmask 261120   ;;  %s426_s1 = inlined_call_operand.vmem [shape: bf16[32,128], index: 1, kind: input, shape index: {}]   ;;  %s427_s2 = inlined_call_operand.vmem [shape: bf16[128,128], index: 2, kind: input, shape index: {}]   ;;  %s428_s0 = inlined_call_operand.vmem [shape: bf16[16,32], index: 0, kind: input, shape index: {}]   ;;  %s429_s3 = inlined_call_operand.vmem [shape: bf16[128,128], index: 3, kind: input, shape index: {}]   ;;  %s430_s4 = inlined_call_operand.vmem [shape: f32[8,128], index: 4, kind: input, shape index: {}]   ;;  %s431_s5 = inlined_call_operand.vmem [shape: f32[16,128], index: 5, kind: output, shape index: {}]  }
   0x1   :  { %v313_v0 = vld [vmem:[%s426_s1 + $0x8] sm:$0xff]  ;;  %v321_v1 = vld [vmem:[%s427_s2 + $0x38] sm:$0xff]  ;;  %v312_v2 = vld [vmem:[%s426_s1] sm:$0xff] }
   0x2   :  { %56 = vmatpush.bf16.msra.mxu0 %v313_v0  ;;  %132 = vmatpush.bf16.msra.mxu1 %v321_v1  ;;  %v320_v3 = vld [vmem:[%s427_s2 + $0x30] sm:$0xff]  ;;  %v311_v4 = vld [vmem:[%s428_s0] sm:$0xff]  ;;  %v319_v5 = vld [vmem:[%s427_s2 + $0x28] sm:$0xff] }
   0x3   :  { %v318_v6 = vld [vmem:[%s427_s2 + $0x20] sm:$0xff]  ;;  %v317_v7 = vld [vmem:[%s427_s2 + $0x18] sm:$0xff]  ;;  %v316_v8 = vld [vmem:[%s427_s2 + $0x10] sm:$0xff] }
   0x4   :  { %v315_v9 = vld [vmem:[%s427_s2 + $0x8] sm:$0xff]  ;;  %v314_v10 = vld [vmem:[%s427_s2] sm:$0xff]  ;;  %v329_v11 = vld [vmem:[%s429_s3 + $0x38] sm:$0xff] }
   0x5   :  { %214 = vmatpush.bf16.msra.mxu2 %v329_v11  ;;  %v328_v12 = vld [vmem:[%s429_s3 + $0x30] sm:$0xff]  ;;  %v327_v13 = vld [vmem:[%s429_s3 + $0x28] sm:$0xff]  ;;  %v326_v14 = vld [vmem:[%s429_s3 + $0x20] sm:$0xff] }
   0x6   :  { %57 = vmatpush.bf16.msra.mxu0 %v312_v2  ;;  %133 = vmatpush.bf16.msra.mxu1 %v320_v3  ;;  %v23_v15 = vld [vmem:[%s430_s4] sm:$0xff]  ;;  %v325_v24 = vld [vmem:[%s429_s3 + $0x18] sm:$0xff]  ;;  %v324_v25 = vld [vmem:[%s429_s3 + $0x10] sm:$0xff] }
   0x7   :  { %v28_v17 = vperm.slane %v23_v15, 0  ;;  %v323_v26 = vld [vmem:[%s429_s3 + $0x8] sm:$0xff]  ;;  %v322_v27 = vld [vmem:[%s429_s3] sm:$0xff]  ;;  %v83_v29 = vperm.slane %v23_v15, 1  ;;  %v165_v36 = vperm.slane %v23_v15, 2 }
   0x9   :  { %246 = vmatmul.msk.bf16.vlgmr.msra.gmra.mxu0 %vm46_vm0, %v311_v4  ;;  %215 = vmatpush.bf16.msra.mxu2 %v328_v12 }
   0xa   :  { %134 = vmatpush.bf16.msra.mxu1 %v319_v5 }
   0xd   :  { %216 = vmatpush.bf16.msra.mxu2 %v327_v13 }
   0xe   :  { %135 = vmatpush.bf16.msra.mxu1 %v318_v6 }
  0x11   :  { %217 = vmatpush.bf16.msra.mxu2 %v326_v14 }
  0x12   :  { %136 = vmatpush.bf16.msra.mxu1 %v317_v7 }
  0x15   :  { %218 = vmatpush.bf16.msra.mxu2 %v325_v24 }
  0x16   :  { %137 = vmatpush.bf16.msra.mxu1 %v316_v8 }
  0x19   :  { %219 = vmatpush.bf16.msra.mxu2 %v324_v25 }
  0x1a   :  { %138 = vmatpush.bf16.msra.mxu1 %v315_v9 }
  0x1d   :  { %220 = vmatpush.bf16.msra.mxu2 %v323_v26 }
  0x1e   :  { %139 = vmatpush.bf16.msra.mxu1 %v314_v10 }
  0x21   :  { %221 = vmatpush.bf16.msra.mxu2 %v322_v27 }
  0x86   :  { %v59_v16 = vpop.f32.mrf.mxu0 }
  0x87   :  { %v60_v18 = vadd.f32 %v59_v16, %v28_v17 }
  0x89   :  { %v64_v21 = vmax.f32 %v60_v18, 0.0 }
  0x8e   :  { %v61_v19 = vpop.f32.mrf.mxu0 }
  0x8f   :  { %v62_v20 = vadd.f32 %v61_v19, %v28_v17 }
  0x91   :  { %v65_v22 = vmax.f32 %v62_v20, 0.0 }
  0x93   :  { %v66_v23 = vpack.c.bf16 %v65_v22, %v64_v21 }
  0x95   :  { %140 = vmatmul.bf16.vlgmr.msra.gmra.mxu1 %v66_v23 }
 0x112   :  { %v141_v28 = vpop.f32.mrf.mxu1 }
 0x113   :  { %v142_v30 = vadd.f32 %v141_v28, %v83_v29 }
 0x115   :  { %v146_v33 = vmax.f32 %v142_v30, 0.0 }
 0x11a   :  { %v143_v31 = vpop.f32.mrf.mxu1 }
 0x11b   :  { %v144_v32 = vadd.f32 %v143_v31, %v83_v29 }
 0x11d   :  { %v147_v34 = vmax.f32 %v144_v32, 0.0 }
 0x11f   :  { %v148_v35 = vpack.c.bf16 %v147_v34, %v146_v33 }
 0x121   :  { %222 = vmatmul.bf16.vlgmr.msra.gmra.mxu2 %v148_v35 }
 0x1a4   :  { %v223_v37 = vpop.f32.mrf.mxu2 }
 0x1a5   :  { %v224_v38 = vadd.f32 %v223_v37, %v165_v36 }
 0x1a7   :  { %228 = vst [vmem:[%s431_s5] sm:$0xff] %v224_v38 }
 0x1ac   :  { %v225_v39 = vpop.f32.mrf.mxu2 }
 0x1ad   :  { %v226_v40 = vadd.f32 %v225_v39, %v165_v36 }
 0x1af   :  { %229 = vst [vmem:[%s431_s5 + $0x8] sm:$0xff] %v226_v40 }

</bundles_post_ra>
